<compile_context>
chip_gen: v7x
topology: tpu7x:2x2x1
jax: 0.10.0
libtpu: 0.0.40
codegen_flags: <defaults>
</compile_context>

<pallas_src>
import functools

import jax
import jax.numpy as jnp
from jax import lax
from jax.experimental import pallas as pl
from jax.experimental.pallas import tpu as pltpu


def _conv_ln_kernel(x_ref, w_ref, b_ref, g_ref, beta_ref, o_ref, *, K, pad, L_out, eps):
    # x_ref    : (N_b, C_in, L)       bf16 input block (channels-first, unpadded)
    # w_ref    : (C_out, K*C_in)      folded conv weight slab, bf16
    # b_ref    : (C_out, 1)           conv bias, f32
    # g_ref    : (C_out, 1)           layernorm gamma, f32
    # beta_ref : (C_out, 1)           layernorm beta, f32
    # o_ref    : (N_b, C_out, L_out)  output block (lane dim = L_out)
    n_b, c_in, _ = x_ref.shape
    c_out = o_ref.shape[1]

    w = w_ref[...]                                  # (C_out, K*C_in) bf16
    b = b_ref[...].astype(jnp.float32)              # (C_out, 1)
    g = g_ref[...].astype(jnp.float32)
    be = beta_ref[...].astype(jnp.float32)
    inv_c = 1.0 / float(c_out)                      # compile-time constant

    for i in range(n_b):                            # small static unroll over batch block
        x_i = x_ref[i]                              # (C_in, L), bf16
        if pad > 0:
            zpad = jnp.zeros((c_in, pad), dtype=x_i.dtype)
            x_p = jnp.concatenate([zpad, x_i, zpad], axis=-1)   # (C_in, L + 2*pad)
        else:
            x_p = x_i

        # im2col slab: K lane-shifted views stacked along the contraction dim.
        if K > 1:
            slab = jnp.concatenate([x_p[:, j:j + L_out] for j in range(K)], axis=0)
        else:
            slab = x_p[:, :L_out]                   # (K*C_in, L_out)

        # Single folded MXU matmul, f32 accumulation.
        acc = jnp.dot(w, slab, preferred_element_type=jnp.float32) + b   # (C_out, L_out)

        # LayerNorm over channels (sublane axis) — fused sum / sum-of-squares.
        s1 = jnp.sum(acc, axis=0, keepdims=True)                 # (1, L_out)
        s2 = jnp.sum(acc * acc, axis=0, keepdims=True)
        mean = s1 * inv_c
        var = jnp.maximum(s2 * inv_c - mean * mean, 0.0)
        y = (acc - mean) * lax.rsqrt(var + eps)
        y = y * g + be

        o_ref[i] = y.astype(o_ref.dtype)


def conv_1d_forward(x, weight, bias, gamma, beta, *, eps=1e-5,
                    compute_dtype=jnp.bfloat16, batch_block=None):
    """x: (N, C_in, L). weight: (C_out, C_in, K). Returns (N, C_out, L_out)."""
    N, C_in, L = x.shape
    C_out, _, K = weight.shape
    pad = K // 2
    L_out = L + 2 * pad - K + 1

    # Wrapper glue: only dtype casts + weight fold. No pad / transpose HBM passes.
    x_c = x.astype(compute_dtype)                                        # (N, C_in, L)
    # Contraction index is j*C_in + c_in, matching the in-kernel slab order.
    w_slab = jnp.transpose(weight, (0, 2, 1)).reshape(C_out, K * C_in)
    w_slab = w_slab.astype(compute_dtype)                                # (C_out, K*C_in)
    b2 = bias.reshape(C_out, 1).astype(jnp.float32)
    g2 = gamma.reshape(C_out, 1).astype(jnp.float32)
    be2 = beta.reshape(C_out, 1).astype(jnp.float32)

    # Batch several N per grid step (amortize per-step overhead).
    if batch_block is None:
        batch_block = N if N <= 8 else 1
    if N % batch_block != 0:
        batch_block = 1
    n_blocks = N // batch_block

    # Explicit VMEM budget: double-buffered x/out blocks + weights + scalars,
    # with generous headroom, capped well under v7x's 64 MiB per TC.
    in_item = jnp.dtype(compute_dtype).itemsize
    out_item = jnp.dtype(x.dtype).itemsize
    est = (2 * batch_block * C_in * L * in_item
           + 2 * batch_block * C_out * L_out * out_item
           + 2 * C_out * K * C_in * in_item
           + 6 * C_out * 4)
    vmem_limit = int(min(max(4 * est, 8 * 1024 * 1024), 48 * 1024 * 1024))

    kernel = functools.partial(_conv_ln_kernel, K=K, pad=pad, L_out=L_out, eps=eps)

    out = pl.pallas_call(
        kernel,
        out_shape=jax.ShapeDtypeStruct((N, C_out, L_out), x.dtype),
        grid_spec=pltpu.PrefetchScalarGridSpec(
            num_scalar_prefetch=0,
            grid=(n_blocks,),
            in_specs=[
                pl.BlockSpec((batch_block, C_in, L), lambda n: (n, 0, 0)),
                pl.BlockSpec((C_out, K * C_in), lambda n: (0, 0)),
                pl.BlockSpec((C_out, 1), lambda n: (0, 0)),
                pl.BlockSpec((C_out, 1), lambda n: (0, 0)),
                pl.BlockSpec((C_out, 1), lambda n: (0, 0)),
            ],
            out_specs=pl.BlockSpec((batch_block, C_out, L_out), lambda n: (n, 0, 0)),
        ),
        compiler_params=pltpu.CompilerParams(
            dimension_semantics=("parallel",),
            vmem_limit_bytes=vmem_limit,
        ),
    )(x_c, w_slab, b2, g2, be2)

    return out                                                           # (N, C_out, L_out)


def _reference(x, weight, bias, gamma, beta, eps=1e-5):
    """Plain-JAX reference reproducing Conv1d(padding=K//2) + LayerNorm(C_out)."""
    K = weight.shape[-1]
    y = lax.conv_general_dilated(
        x, weight,
        window_strides=(1,),
        padding=[(K // 2, K // 2)],
        dimension_numbers=("NCH", "OIH", "NCH"),
        precision=lax.Precision.HIGHEST,
    ) + bias[None, :, None]
    y_nlc = jnp.transpose(y, (0, 2, 1))
    mean = jnp.mean(y_nlc, axis=-1, keepdims=True)
    var = jnp.mean((y_nlc - mean) ** 2, axis=-1, keepdims=True)
    yn = (y_nlc - mean) / jnp.sqrt(var + eps) * gamma + beta
    return jnp.transpose(yn, (0, 2, 1))


if __name__ == "__main__":
    # Module-consistent small shapes: batch=2, in_channels=4, out_channels=8,
    # kernel_size=3, sequence length=16.
    N, C_IN, C_OUT, K, L = 2, 4, 8, 3, 16

    key = jax.random.PRNGKey(0)
    kx, kw, kb, kg, kbe = jax.random.split(key, 5)

    x = jax.random.normal(kx, (N, C_IN, L), dtype=jnp.float32)
    weight = jax.random.normal(kw, (C_OUT, C_IN, K), dtype=jnp.float32) * 0.1
    bias = jax.random.normal(kb, (C_OUT,), dtype=jnp.float32) * 0.1
    gamma = jnp.ones((C_OUT,), dtype=jnp.float32) + 0.05 * jax.random.normal(kg, (C_OUT,))
    beta = 0.05 * jax.random.normal(kbe, (C_OUT,), dtype=jnp.float32)

    out = conv_1d_forward(x, weight, bias, gamma, beta)
    out = jax.block_until_ready(out)
    assert out.shape == (N, C_OUT, L), out.shape

    # The kernel feeds the MXU bf16 operands (per perf guidance); compare
    # against an f32 reference driven by identically bf16-quantized inputs so
    # the check isolates kernel math (conv fold + fused-LN) from the chosen
    # input precision. Accumulation / LayerNorm are f32 in both paths.
    xq = x.astype(jnp.bfloat16).astype(jnp.float32)
    wq = weight.astype(jnp.bfloat16).astype(jnp.float32)
    ref = _reference(xq, wq, bias, gamma, beta)
    assert jnp.allclose(out, ref, atol=2e-3, rtol=2e-3), "mismatch vs reference"

    print("KERNEL_OK")
</pallas_src>

<mosaic_0001>
module attributes {stable_mosaic.version = 11 : i64} {
  func.func @_conv_ln_kernel(%arg0: i32, %arg1: memref<2x4x16xbf16, #tpu.memory_space<vmem>>, %arg2: memref<8x12xbf16, #tpu.memory_space<vmem>>, %arg3: memref<8x1xf32, #tpu.memory_space<vmem>>, %arg4: memref<8x1xf32, #tpu.memory_space<vmem>>, %arg5: memref<8x1xf32, #tpu.memory_space<vmem>>, %arg6: memref<2x8x16xf32, #tpu.memory_space<vmem>>) attributes {dimension_semantics = [#tpu.dimension_semantics<parallel>], iteration_bounds = array<i64: 1>, scalar_prefetch = 0 : i64, scratch_operands = 0 : i64, tpu.core_type = #tpu.core_type<tc>, window_params = [{transform_indices = @transform_0, window_bounds = array<i64: 2, 4, 16>}, {pipeline_mode = #tpu.pipeline_mode<synchronous>, transform_indices = @transform_1, window_bounds = array<i64: 8, 12>}, {pipeline_mode = #tpu.pipeline_mode<synchronous>, transform_indices = @transform_2, window_bounds = array<i64: 8, 1>}, {pipeline_mode = #tpu.pipeline_mode<synchronous>, transform_indices = @transform_3, window_bounds = array<i64: 8, 1>}, {pipeline_mode = #tpu.pipeline_mode<synchronous>, transform_indices = @transform_4, window_bounds = array<i64: 8, 1>}, {transform_indices = @transform_5, window_bounds = array<i64: 2, 8, 16>}]} {
    %c0 = arith.constant 0 : index
    %c0_0 = arith.constant 0 : index
    %0 = vector.load %arg2[%c0, %c0_0] : memref<8x12xbf16, #tpu.memory_space<vmem>>, vector<8x12xbf16>
    %c0_1 = arith.constant 0 : index
    %c0_2 = arith.constant 0 : index
    %1 = vector.load %arg3[%c0_1, %c0_2] : memref<8x1xf32, #tpu.memory_space<vmem>>, vector<8x1xf32>
    %c0_3 = arith.constant 0 : index
    %c0_4 = arith.constant 0 : index
    %2 = vector.load %arg4[%c0_3, %c0_4] : memref<8x1xf32, #tpu.memory_space<vmem>>, vector<8x1xf32>
    %c0_5 = arith.constant 0 : index
    %c0_6 = arith.constant 0 : index
    %3 = vector.load %arg5[%c0_5, %c0_6] : memref<8x1xf32, #tpu.memory_space<vmem>>, vector<8x1xf32>
    %c0_7 = arith.constant 0 : index
    %c0_8 = arith.constant 0 : index
    %c0_9 = arith.constant 0 : index
    %4 = vector.load %arg1[%c0_7, %c0_8, %c0_9] : memref<2x4x16xbf16, #tpu.memory_space<vmem>>, vector<1x4x16xbf16>
    %5 = vector.shape_cast %4 : vector<1x4x16xbf16> to vector<4x16xbf16>
    %cst = arith.constant 0.000000e+00 : bf16
    %6 = vector.broadcast %cst : bf16 to vector<4x1xbf16>
    %7 = tpu.concatenate %6, %5, %6 in 1 : vector<4x1xbf16>, vector<4x16xbf16>, vector<4x1xbf16> -> vector<4x18xbf16>
    %8 = vector.extract_strided_slice %7 {offsets = [0, 0], sizes = [4, 16], strides = [1, 1]} : vector<4x18xbf16> to vector<4x16xbf16>
    %9 = vector.extract_strided_slice %7 {offsets = [0, 1], sizes = [4, 16], strides = [1, 1]} : vector<4x18xbf16> to vector<4x16xbf16>
    %10 = vector.extract_strided_slice %7 {offsets = [0, 2], sizes = [4, 16], strides = [1, 1]} : vector<4x18xbf16> to vector<4x16xbf16>
    %11 = tpu.concatenate %8, %9, %10 in 0 : vector<4x16xbf16>, vector<4x16xbf16>, vector<4x16xbf16> -> vector<12x16xbf16>
    %cst_10 = arith.constant dense<0.000000e+00> : vector<8x16xf32>
    %12 = tpu.matmul %0, %11, %cst_10 {dimension_numbers = #tpu.dot_dimension_numbers<[1], [0], [0], [1], [0, 0, 1, 1], [], []>} : vector<8x12xbf16>, vector<12x16xbf16>, vector<8x16xf32> -> vector<8x16xf32>
    %13 = vector.broadcast %1 : vector<8x1xf32> to vector<8x16xf32>
    %14 = arith.addf %12, %13 : vector<8x16xf32>
    %cst_11 = arith.constant dense<0.000000e+00> : vector<16xf32>
    %15 = vector.multi_reduction <add>, %14, %cst_11 [0] : vector<8x16xf32> to vector<16xf32>
    %16 = vector.shape_cast %15 : vector<16xf32> to vector<1x16xf32>
    %17 = arith.mulf %14, %14 : vector<8x16xf32>
    %cst_12 = arith.constant dense<0.000000e+00> : vector<16xf32>
    %18 = vector.multi_reduction <add>, %17, %cst_12 [0] : vector<8x16xf32> to vector<16xf32>
    %19 = vector.shape_cast %18 : vector<16xf32> to vector<1x16xf32>
    %cst_13 = arith.constant 1.250000e-01 : f32
    %20 = vector.broadcast %cst_13 : f32 to vector<1x16xf32>
    %21 = arith.mulf %16, %20 : vector<1x16xf32>
    %cst_14 = arith.constant 1.250000e-01 : f32
    %22 = vector.broadcast %cst_14 : f32 to vector<1x16xf32>
    %23 = arith.mulf %19, %22 : vector<1x16xf32>
    %24 = arith.mulf %21, %21 : vector<1x16xf32>
    %25 = arith.subf %23, %24 : vector<1x16xf32>
    %cst_15 = arith.constant 0.000000e+00 : f32
    %26 = vector.broadcast %cst_15 : f32 to vector<1x16xf32>
    %27 = arith.maximumf %25, %26 : vector<1x16xf32>
    %28 = vector.broadcast %21 : vector<1x16xf32> to vector<8x16xf32>
    %29 = arith.subf %14, %28 : vector<8x16xf32>
    %cst_16 = arith.constant 9.99999974E-6 : f32
    %30 = vector.broadcast %cst_16 : f32 to vector<1x16xf32>
    %31 = arith.addf %27, %30 : vector<1x16xf32>
    %32 = math.rsqrt %31 : vector<1x16xf32>
    %33 = vector.broadcast %32 : vector<1x16xf32> to vector<8x16xf32>
    %34 = arith.mulf %29, %33 : vector<8x16xf32>
    %35 = vector.broadcast %2 : vector<8x1xf32> to vector<8x16xf32>
    %36 = arith.mulf %34, %35 : vector<8x16xf32>
    %37 = vector.broadcast %3 : vector<8x1xf32> to vector<8x16xf32>
    %38 = arith.addf %36, %37 : vector<8x16xf32>
    %c0_17 = arith.constant 0 : index
    %c0_18 = arith.constant 0 : index
    %c0_19 = arith.constant 0 : index
    %39 = vector.load %arg6[%c0_17, %c0_18, %c0_19] : memref<2x8x16xf32, #tpu.memory_space<vmem>>, vector<1x8x16xf32>
    %40 = vector.shape_cast %39 : vector<1x8x16xf32> to vector<8x16xf32>
    %41 = vector.shape_cast %38 : vector<8x16xf32> to vector<1x8x16xf32>
    tpu.vector_store %arg6[%c0_17, %c0_18, %c0_19], %41 {strides = array<i32>} : memref<2x8x16xf32, #tpu.memory_space<vmem>>, vector<1x8x16xf32>,
    %c1 = arith.constant 1 : index
    %c0_20 = arith.constant 0 : index
    %c0_21 = arith.constant 0 : index
    %42 = vector.load %arg1[%c1, %c0_20, %c0_21] : memref<2x4x16xbf16, #tpu.memory_space<vmem>>, vector<1x4x16xbf16>
    %43 = vector.shape_cast %42 : vector<1x4x16xbf16> to vector<4x16xbf16>
    %cst_22 = arith.constant 0.000000e+00 : bf16
    %44 = vector.broadcast %cst_22 : bf16 to vector<4x1xbf16>
    %45 = tpu.concatenate %44, %43, %44 in 1 : vector<4x1xbf16>, vector<4x16xbf16>, vector<4x1xbf16> -> vector<4x18xbf16>
    %46 = vector.extract_strided_slice %45 {offsets = [0, 0], sizes = [4, 16], strides = [1, 1]} : vector<4x18xbf16> to vector<4x16xbf16>
    %47 = vector.extract_strided_slice %45 {offsets = [0, 1], sizes = [4, 16], strides = [1, 1]} : vector<4x18xbf16> to vector<4x16xbf16>
    %48 = vector.extract_strided_slice %45 {offsets = [0, 2], sizes = [4, 16], strides = [1, 1]} : vector<4x18xbf16> to vector<4x16xbf16>
    %49 = tpu.concatenate %46, %47, %48 in 0 : vector<4x16xbf16>, vector<4x16xbf16>, vector<4x16xbf16> -> vector<12x16xbf16>
    %cst_23 = arith.constant dense<0.000000e+00> : vector<8x16xf32>
    %50 = tpu.matmul %0, %49, %cst_23 {dimension_numbers = #tpu.dot_dimension_numbers<[1], [0], [0], [1], [0, 0, 1, 1], [], []>} : vector<8x12xbf16>, vector<12x16xbf16>, vector<8x16xf32> -> vector<8x16xf32>
    %51 = vector.broadcast %1 : vector<8x1xf32> to vector<8x16xf32>
    %52 = arith.addf %50, %51 : vector<8x16xf32>
    %cst_24 = arith.constant dense<0.000000e+00> : vector<16xf32>
    %53 = vector.multi_reduction <add>, %52, %cst_24 [0] : vector<8x16xf32> to vector<16xf32>
    %54 = vector.shape_cast %53 : vector<16xf32> to vector<1x16xf32>
    %55 = arith.mulf %52, %52 : vector<8x16xf32>
    %cst_25 = arith.constant dense<0.000000e+00> : vector<16xf32>
    %56 = vector.multi_reduction <add>, %55, %cst_25 [0] : vector<8x16xf32> to vector<16xf32>
    %57 = vector.shape_cast %56 : vector<16xf32> to vector<1x16xf32>
    %cst_26 = arith.constant 1.250000e-01 : f32
    %58 = vector.broadcast %cst_26 : f32 to vector<1x16xf32>
    %59 = arith.mulf %54, %58 : vector<1x16xf32>
    %cst_27 = arith.constant 1.250000e-01 : f32
    %60 = vector.broadcast %cst_27 : f32 to vector<1x16xf32>
    %61 = arith.mulf %57, %60 : vector<1x16xf32>
    %62 = arith.mulf %59, %59 : vector<1x16xf32>
    %63 = arith.subf %61, %62 : vector<1x16xf32>
    %cst_28 = arith.constant 0.000000e+00 : f32
    %64 = vector.broadcast %cst_28 : f32 to vector<1x16xf32>
    %65 = arith.maximumf %63, %64 : vector<1x16xf32>
    %66 = vector.broadcast %59 : vector<1x16xf32> to vector<8x16xf32>
    %67 = arith.subf %52, %66 : vector<8x16xf32>
    %cst_29 = arith.constant 9.99999974E-6 : f32
    %68 = vector.broadcast %cst_29 : f32 to vector<1x16xf32>
    %69 = arith.addf %65, %68 : vector<1x16xf32>
    %70 = math.rsqrt %69 : vector<1x16xf32>
    %71 = vector.broadcast %70 : vector<1x16xf32> to vector<8x16xf32>
    %72 = arith.mulf %67, %71 : vector<8x16xf32>
    %73 = vector.broadcast %2 : vector<8x1xf32> to vector<8x16xf32>
    %74 = arith.mulf %72, %73 : vector<8x16xf32>
    %75 = vector.broadcast %3 : vector<8x1xf32> to vector<8x16xf32>
    %76 = arith.addf %74, %75 : vector<8x16xf32>
    %c1_30 = arith.constant 1 : index
    %c0_31 = arith.constant 0 : index
    %c0_32 = arith.constant 0 : index
    %77 = vector.load %arg6[%c1_30, %c0_31, %c0_32] : memref<2x8x16xf32, #tpu.memory_space<vmem>>, vector<1x8x16xf32>
    %78 = vector.shape_cast %77 : vector<1x8x16xf32> to vector<8x16xf32>
    %79 = vector.shape_cast %76 : vector<8x16xf32> to vector<1x8x16xf32>
    tpu.vector_store %arg6[%c1_30, %c0_31, %c0_32], %79 {strides = array<i32>} : memref<2x8x16xf32, #tpu.memory_space<vmem>>, vector<1x8x16xf32>,
    return
  }
  func.func @transform_0(%arg0: i32) -> (i32, i32, i32) {
    %c0_i32 = arith.constant 0 : i32
    %c0_i32_0 = arith.constant 0 : i32
    %c0_i32_1 = arith.constant 0 : i32
    return %arg0, %c0_i32, %c0_i32_0 : i32, i32, i32
  }
  func.func @transform_1(%arg0: i32) -> (i32, i32) {
    %c0_i32 = arith.constant 0 : i32
    %c0_i32_0 = arith.constant 0 : i32
    %c0_i32_1 = arith.constant 0 : i32
    return %c0_i32, %c0_i32_0 : i32, i32
  }
  func.func @transform_2(%arg0: i32) -> (i32, i32) {
    %c0_i32 = arith.constant 0 : i32
    %c0_i32_0 = arith.constant 0 : i32
    %c0_i32_1 = arith.constant 0 : i32
    return %c0_i32, %c0_i32_0 : i32, i32
  }
  func.func @transform_3(%arg0: i32) -> (i32, i32) {
    %c0_i32 = arith.constant 0 : i32
    %c0_i32_0 = arith.constant 0 : i32
    %c0_i32_1 = arith.constant 0 : i32
    return %c0_i32, %c0_i32_0 : i32, i32
  }
  func.func @transform_4(%arg0: i32) -> (i32, i32) {
    %c0_i32 = arith.constant 0 : i32
    %c0_i32_0 = arith.constant 0 : i32
    %c0_i32_1 = arith.constant 0 : i32
    return %c0_i32, %c0_i32_0 : i32, i32
  }
  func.func @transform_5(%arg0: i32) -> (i32, i32, i32) {
    %c0_i32 = arith.constant 0 : i32
    %c0_i32_0 = arith.constant 0 : i32
    %c0_i32_1 = arith.constant 0 : i32
    return %arg0, %c0_i32, %c0_i32_0 : i32, i32, i32
  }
}

</mosaic_0001>

<bundles_post_ra>
// kernel: tpu_custom_call.1
= control target key start
LH: loop header
LB: loop body
LE: loop exit
PB: predicated region body
PF: predicated region fallthrough
CT: control target
= control target key end

     0   :  { %s318_s20 = smov 1   ;;  %s393_s0 = inlined_call_operand.vmem [shape: bf16[2,4,16], index: 0, kind: input, shape index: {}]   ;;  %s394_s1 = inlined_call_operand.vmem [shape: bf16[8,12], index: 1, kind: input, shape index: {}]   ;;  %s395_s2 = inlined_call_operand.vmem [shape: f32[8,1], index: 2, kind: input, shape index: {}]   ;;  %s396_s3 = inlined_call_operand.vmem [shape: f32[8,1], index: 3, kind: input, shape index: {}]   ;;  %s397_s4 = inlined_call_operand.vmem [shape: f32[8,1], index: 4, kind: input, shape index: {}]   ;;  %s398_s5 = inlined_call_operand.hbm [shape: f32[2,8,16], index: 5, kind: output, shape index: {}]  }
   0x1   :  { %v258_v0 = vld.sshfl [vmem:[%s393_s0] sm:$0x3 pattern:$0x76325410] }
   0x2   :  { %35 = vrot.lane.b32.xlu0 %v258_v0, %s318_s20  ;;  %v261_v1 = vld.sshfl [vmem:[%s393_s0 + $0x2] sm:$0x3 pattern:$0x76325410] }
   0x3   :  { %10 = vsyncpa [#allocation3], 0  ;;  %v319_v2 = vmov 0.0   ;;  %vm320_vm0 = vmmov 0   ;;  %vm37_vm1 = vcmask 7168   ;;  %vm41_vm2 = vcmask 138240  }
   0x4   :  { %267 = vmatprep.subr.bf16.mxu0 %v319_v2  ;;  %273 = vmatprep.subr.bf16.mxu1 %v319_v2  ;;  %s321_s23 = smov 126   ;;  %s322_s0 = smov 127   ;;  %v323_v11 = vmov 0   ;;  %v23_v12 = vld [vmem:[%s395_s2] sm:$0xff]  ;;  %vm50_vm3 = vcmask 1041408   ;;  %vm53_vm4 = vcmask 1043456  }
   0x5   :  { %269 = vmatprep.mubr.msk.bf16.mxu0 %vm320_vm0, %v319_v2  ;;  %275 = vmatprep.mubr.msk.bf16.mxu1 %vm320_vm0, %v319_v2  ;;  %v24_v15 = vld [vmem:[%s396_s3] sm:$0xff]  ;;  %vm65_vm5 = vcmask 1045504   ;;  %vm61_vm6 = vcmask 97280   ;;  %vm108_vm7 = vcmask 130048  }
   0x6   :  { %156 = vrot.lane.b32.xlu0 %v261_v1, %s318_s20  ;;  %289 = vset.pattern.permute.xlu1 %v323_v11  ;;  %v25_v16 = vld [vmem:[%s397_s4] sm:$0xff] }
   0x7   :  { %288 = vset.pattern.permute.xlu0 %v323_v11  ;;  %v22_v23 = vld [vmem:[%s394_s1] sm:$0xf]  ;;  %s324_s1 = smov [#allocation2]  }
   0x8   :  { %s247_s3 = sshll.u32 %s324_s1, 4  ;;  %s248_s3 = int_to_ptr.vmem [resolvable:$true] %s247_s3 }
   0x9   :  { %s294_s4 = scalar_lea.vmem %s248_s3, 256  ;;  %p299_p1 = scmp.lt.s32.totalorder %s248_s3, %s248_s3 }
   0xa   :  { %p295_p0 = scmp.ne.s32.totalorder %s248_s3, %s294_s4  ;;  %p300_p2 = scmp.lt.s32.totalorder %s294_s4, %s294_s4 }
   0xc   :  { %p301_p3 = por %p300_p2, %p299_p1 }
   0xe   :  { %p302_p4 = pnand %p301_p3, %p295_p0 }
  0x74   :  { %v36_v3 = vpop.permute.xlu0 %35 }
  0x75   :  { %v40_v4 = vsel %vm37_vm1, 0, %v36_v3 }
  0x76   :  { %v42_v5 = vsel %vm41_vm2, %v40_v4, 0 }
  0x77   :  { %v47_v6 = vrot.slane %v42_v5, 4  ;;  %v44_v7 = vrot.slane %v42_v5, 6 }
  0x78   :  { %v157_v8 = vpop.permute.xlu0 %156 }
  0x79   :  { %v159_v9 = vsel %vm37_vm1, 0, %v157_v8  ;;  %48 = vrot.lane.b32.xlu0 %v47_v6, %s321_s23  ;;  %45 = vrot.lane.b32.xlu1 %v44_v7, %s322_s0 }
  0x7a   :  { %v160_v10 = vsel %vm41_vm2, %v159_v9, 0 }
  0x7b   :  { %v162_v13 = vrot.slane %v160_v10, 6  ;;  %v165_v14 = vrot.slane %v160_v10, 4 }
  0x7d   :  { %163 = vrot.lane.b32.xlu1 %v162_v13, %s322_s0  ;;  %58 = vperm.xlu0 %288, %v23_v12  }
  0x81   :  { %166 = vrot.lane.b32.xlu1 %v165_v14, %s321_s23 }
  0x85   :  { %135 = vperm.xlu1 %289, %v24_v15  }
  0x89   :  { %141 = vperm.xlu1 %289, %v25_v16  }
  0xeb   :  { %v46_v17 = vpop.permute.xlu1 %45  ;;  %v49_v18 = vpop.permute.xlu0 %48 }
  0xec   :  { %v52_v19 = vsel %vm50_vm3, %v42_v5, %v46_v17 }
  0xed   :  { %v55_v20 = vsel %vm53_vm4, %v52_v19, %v49_v18 }
  0xee   :  { %v66_v21 = vsel %vm65_vm5, %v55_v20, 0 }
  0xef   :  { %v164_v22 = vpop.permute.xlu1 %163  ;;  %268 = vmatpush3.bf16.msra.mxu0 %v66_v21 }
  0xf0   :  { %v169_v24 = vsel %vm50_vm3, %v160_v10, %v164_v22 }
  0xf2   :  { %270 = vmatmul.mubr.msk.bf16.vlgmr.msra.gmra.mrb[0].mxu0 %vm61_vm6, %v22_v23 }
  0xf3   :  { %v167_v25 = vpop.permute.xlu1 %166 }
  0xf4   :  { %v171_v26 = vsel %vm53_vm4, %v169_v24, %v167_v25 }
  0xf5   :  { %v172_v27 = vsel %vm65_vm5, %v171_v26, 0 }
  0xf6   :  { %274 = vmatpush3.bf16.msra.mxu1 %v172_v27 }
  0xf9   :  { %276 = vmatmul.mubr.msk.bf16.vlgmr.msra.gmra.mrb[0].mxu1 %vm61_vm6, %v22_v23 }
  0xfc   :  { %v59_v28 = vpop.permute.xlu0 %58 }
 0x104   :  { %v136_v17 = vpop.permute.xlu1 %135 }
 0x108   :  { %v142_v21 = vpop.permute.xlu1 %141 }
 0x1c5   :  { %v102_v29 = vpop.f32.mrb[0].mxu0 }
 0x1c6   :  { %v103_v30 = vadd.f32 %v102_v29, %v59_v28  ;;  %v271_v31 = vpop.f32.mrb[1].mxu0 }
 0x1c7   :  { %v105_v32 = vpop.f32.mrb[2].mxu0 }
 0x1c8   :  { %v109_v33 = vsel %vm108_vm7, %v103_v30, 0.0  ;;  %v116_v34 = vmul.f32 %v103_v30, %v103_v30  ;;  %v272_v35 = vpop.f32.mrb[3].mxu0 }
 0x1c9   :  { %v110_v36 = vrot.slane %v109_v33, 4 }
 0x1ca   :  { %v117_v37 = vsel %vm108_vm7, %v116_v34, 0.0 }
 0x1cb   :  { %v111_v38 = vadd.f32 %v110_v36, %v109_v33  ;;  %v118_v39 = vrot.slane %v117_v37, 4 }
 0x1cc   :  { %v208_v40 = vpop.f32.mrb[0].mxu1 }
 0x1cd   :  { %v112_v41 = vrot.slane %v111_v38, 2  ;;  %v119_v42 = vadd.f32 %v118_v39, %v117_v37  ;;  %v209_v43 = vadd.f32 %v208_v40, %v59_v28  ;;  %v277_v44 = vpop.f32.mrb[1].mxu1 }
 0x1ce   :  { %v211_v45 = vpop.f32.mrb[2].mxu1 }
 0x1cf   :  { %v113_v46 = vadd.f32 %v112_v41, %v111_v38  ;;  %v120_v47 = vrot.slane %v119_v42, 2  ;;  %v214_v48 = vsel %vm108_vm7, %v209_v43, 0.0  ;;  %v221_v49 = vmul.f32 %v209_v43, %v209_v43  ;;  %v278_v50 = vpop.f32.mrb[3].mxu1 }
 0x1d0   :  { %v215_v51 = vrot.slane %v214_v48, 4 }
 0x1d1   :  { %v114_v52 = vrot.slane %v113_v46, 1  ;;  %v121_v53 = vadd.f32 %v120_v47, %v119_v42  ;;  %v222_v54 = vsel %vm108_vm7, %v221_v49, 0.0 }
 0x1d2   :  { %v216_v55 = vadd.f32 %v215_v51, %v214_v48  ;;  %v223_v56 = vrot.slane %v222_v54, 4 }
 0x1d3   :  { %v115_v57 = vadd.f32 %v114_v52, %v113_v46  ;;  %v122_v58 = vrot.slane %v121_v53, 1 }
 0x1d4   :  { %v217_v59 = vrot.slane %v216_v55, 2  ;;  %v224_v60 = vadd.f32 %v223_v56, %v222_v54 }
 0x1d5   :  { %v123_v61 = vadd.f32 %v122_v58, %v121_v53  ;;  %v124_v62 = vmul.f32 0.125, %v115_v57 }
 0x1d6   :  { %v218_v63 = vadd.f32 %v217_v59, %v216_v55  ;;  %v225_v0 = vrot.slane %v224_v60, 2 }
 0x1d7   :  { %v125_v1 = vmul.f32 0.125, %v123_v61  ;;  %v126_v2 = vmul.f32 %v124_v62, %v124_v62  ;;  %v129_v18 = vsub.f32 %v103_v30, %v124_v62 }
 0x1d8   :  { %v219_v3 = vrot.slane %v218_v63, 1  ;;  %v226_v4 = vadd.f32 %v225_v0, %v224_v60 }
 0x1d9   :  { %v127_v5 = vsub.f32 %v125_v1, %v126_v2 }
 0x1da   :  { %v220_v6 = vadd.f32 %v219_v3, %v218_v63  ;;  %v227_v7 = vrot.slane %v226_v4, 1 }
 0x1db   :  { %v128_v8 = vmax.f32 %v127_v5, 0.0 }
 0x1dc   :  { %v228_v9 = vadd.f32 %v227_v7, %v226_v4  ;;  %v229_v10 = vmul.f32 0.125, %v220_v6 }
 0x1dd   :  { %v130_v11 = vadd.f32 1e-05, %v128_v8 }
 0x1de   :  { %v230_v12 = vmul.f32 0.125, %v228_v9  ;;  %v231_v13 = vmul.f32 %v229_v10, %v229_v10  ;;  %v234_v24 = vsub.f32 %v209_v43, %v229_v10 }
 0x1df   :  { %290 = vrsqrt.f32 %v130_v11 }
 0x1e0   :  { %v232_v14 = vsub.f32 %v230_v12, %v231_v13 }
 0x1e2   :  { %v233_v15 = vmax.f32 %v232_v14, 0.0 }
 0x1e4   :  { %v235_v16 = vadd.f32 1e-05, %v233_v15 }
 0x1e6   :  { %292 = vrsqrt.f32 %v235_v16 }
 0x1e9   :  { %v291_v19 = vpop.eup %290 }
 0x1ea   :  { %v132_v20 = vmul.f32 %v291_v19, %v129_v18 }
 0x1ec   :  { %v138_v22 = vmul.f32 %v136_v17, %v132_v20 }
 0x1ee   :  { %v144_v23 = vadd.f32 %v142_v21, %v138_v22 }
 0x1f0   :  { %v293_v25 = vpop.eup %292  ;;  %145 = vst.msk [vmem:[#allocation2] sm:$0xff] %vm108_vm7, %v144_v23 }
 0x1f1   :  { %v237_v26 = vmul.f32 %v293_v25, %v234_v24 }
 0x1f3   :  { %v238_v27 = vmul.f32 %v237_v26, %v136_v17 }
 0x1f5   :  { %v239_v28 = vadd.f32 %v238_v27, %v142_v21 }
 0x1f7   :  { %241 = vst.msk [vmem:[#allocation2 + $0x8] sm:$0xff] %vm108_vm7, %v239_v28 }
 0x1f8   :  { %305 = shalt.err (!%p302_p4)
}
 0x1f9   :  { %s306_s8 = scalar_lea.hbm %s398_s5, 256 }
 0x1fa   :  { %p307_p5 = scmp.ne.s32.totalorder %s398_s5, %s306_s8  ;;  %p310_p6 = scmp.lt.u32.totalorder %s306_s8, %s398_s5 }
 0x1fc   :  { %p312_p7 = pnand %p310_p6, %p307_p5 }
 0x1fe   :  { %315 = shalt.err (!%p312_p7)
}
 0x1ff   :  { %s325_s13 = smov 128   ;;  %s326_s14 = smov 8  }
 0x200   :  { %253 = dma.vmem_to_hbm [thread:$0]  %s248_s3, 256, %s398_s5, [#allocation3], %s325_s13, %s325_s13, %s326_s14  }
 0x201   :  { %316 = dma.done.wait [#allocation3], 256  }
 0x202   :  { %317 = vsyncadd [#allocation3], 4294967040 }
 0x203   :  { %257 = vsyncpa [#allocation3], 1 }

</bundles_post_ra>
